<compile_context>
chip_gen: v7x
topology: tpu7x:2x2x1
jax: 0.10.0
libtpu: 0.0.40
codegen_flags: <defaults>
</compile_context>

<pallas_src>
import jax
import jax.numpy as jnp
from jax.experimental import pallas as pl
from jax.experimental.pallas import tpu as pltpu

LANE = 128            # vreg lane width (same on v5e/v6e/v7x)
MAX_TM = 4096         # rows per tile: 4096*128*4B = 2 MiB -> ~85%+ of HBM roofline
MIN_SPLIT_ROWS = 128  # below this keep a single block; above, keep >=2 grid steps


def _round_up(n, m):
    return (n + m - 1) // m * m


def linear_kernel(params_ref, x_ref, o_ref):
    # params_ref: SMEM (2,) f32 -> [weight, bias], read as scalars (sreg path).
    # x_ref / o_ref: (tm, 128) VMEM tiles -> one VPU fma per vreg, no MXU.
    w = params_ref[0]
    b = params_ref[1]
    o_ref[...] = (x_ref[...] * w + b).astype(o_ref.dtype)


@jax.jit
def net_forward(x, weight, bias):
    """Net.forward: y = x @ W^T + b for Linear(1, 1) -> elementwise fma.

    x: (B, 1), weight: (1, 1), bias: (1,) -> (B, 1)
    """
    B, in_features = x.shape
    assert in_features == 1, "Net.fc1 is Linear(1, 1)"
    dtype = x.dtype

    # ---- lane-dense repack ----------------------------------------------
    # Fast path (B % 128 == 0): reshape is a free layout bitcast under jit,
    # no padding and no output slice -> zero extra HBM passes.
    ragged = (B % LANE) != 0
    if ragged:
        rows = pl.cdiv(B, LANE)
        x2d = jnp.pad(x.reshape(-1), (0, rows * LANE - B)).reshape(rows, LANE)
    else:
        rows = B // LANE
        x2d = x.reshape(rows, LANE)

    # ---- tile selection ---------------------------------------------------
    if rows <= MIN_SPLIT_ROWS:
        tm = rows                      # single block == full array dims
    else:
        # >=2 grid steps so v7x's two TensorCores both get work; tm is a
        # multiple of 8 sublanes, capped at MAX_TM.  Trailing partial block
        # (if rows % tm != 0) is handled by Pallas: OOB reads are ignored by
        # the elementwise fma and OOB writes are dropped.
        tm = min(MAX_TM, _round_up(pl.cdiv(rows, 2), 8))
    grid = (pl.cdiv(rows, tm),)

    # weight / bias packed into one tiny scalar-prefetch array (lands in SMEM).
    params = jnp.concatenate(
        [weight.reshape(1), bias.reshape(1)]
    ).astype(jnp.float32)

    y2d = pl.pallas_call(
        linear_kernel,
        out_shape=jax.ShapeDtypeStruct((rows, LANE), dtype),
        grid_spec=pltpu.PrefetchScalarGridSpec(
            num_scalar_prefetch=1,
            grid=grid,
            in_specs=[pl.BlockSpec((tm, LANE), lambda i, p: (i, 0))],
            out_specs=pl.BlockSpec((tm, LANE), lambda i, p: (i, 0)),
        ),
        compiler_params=pltpu.CompilerParams(
            dimension_semantics=("parallel",),  # shard batch tiles across TCs (v7x)
        ),
    )(params, x2d)

    if ragged:
        # Drop padding, restore PyTorch Linear output layout (B, 1).
        return y2d.reshape(-1)[:B].reshape(B, 1)
    return y2d.reshape(B, 1)


if __name__ == "__main__":
    key = jax.random.PRNGKey(0)
    B = 8
    x = jax.random.normal(key, (B, 1), dtype=jnp.float32)

    # Deterministic parameters matching Net.__init__:
    #   self.fc1.weight.data = torch.full((1, 1), 0.5)
    #   self.fc1.bias.data   = torch.full((1,), 1.0)
    weight = jnp.full((1, 1), 0.5, dtype=jnp.float32)
    bias = jnp.full((1,), 1.0, dtype=jnp.float32)

    # Ragged / small path.
    y = jax.block_until_ready(net_forward(x, weight, bias))
    y_ref = x * 0.5 + 1.0
    assert y.shape == (B, 1) and y.dtype == jnp.float32
    assert jnp.allclose(y, y_ref, atol=1e-6, rtol=1e-6)

    # Lane-aligned fast path (no pad, no slice).
    B2 = 1024
    x2 = jax.random.normal(jax.random.PRNGKey(1), (B2, 1), dtype=jnp.float32)
    y2 = jax.block_until_ready(net_forward(x2, weight, bias))
    assert y2.shape == (B2, 1)
    assert jnp.allclose(y2, x2 * 0.5 + 1.0, atol=1e-6, rtol=1e-6)

    print("KERNEL_OK")
</pallas_src>

<mosaic_0001>
module attributes {stable_mosaic.version = 11 : i64} {
  func.func @linear_kernel(%arg0: i32, %arg1: memref<2xf32, #tpu.memory_space<smem>>, %arg2: memref<1x128xf32, #tpu.memory_space<vmem>>, %arg3: memref<1x128xf32, #tpu.memory_space<vmem>>) attributes {dimension_semantics = [#tpu.dimension_semantics<parallel>], iteration_bounds = array<i64: 1>, scalar_prefetch = 1 : i64, scratch_operands = 0 : i64, tpu.core_type = #tpu.core_type<tc>, window_params = [{transform_indices = @transform_0, window_bounds = array<i64: 1, 128>}, {transform_indices = @transform_1, window_bounds = array<i64: 1, 128>}]} {
    %c0 = arith.constant 0 : index
    %0 = memref.load %arg1[%c0] : memref<2xf32, #tpu.memory_space<smem>>
    %c1 = arith.constant 1 : index
    %1 = memref.load %arg1[%c1] : memref<2xf32, #tpu.memory_space<smem>>
    %c0_0 = arith.constant 0 : index
    %c0_1 = arith.constant 0 : index
    %2 = vector.load %arg2[%c0_0, %c0_1] : memref<1x128xf32, #tpu.memory_space<vmem>>, vector<1x128xf32>
    %3 = vector.broadcast %0 : f32 to vector<1x128xf32>
    %4 = arith.mulf %2, %3 : vector<1x128xf32>
    %5 = vector.broadcast %1 : f32 to vector<1x128xf32>
    %6 = arith.addf %4, %5 : vector<1x128xf32>
    %c0_2 = arith.constant 0 : index
    %c0_3 = arith.constant 0 : index
    %7 = vector.load %arg3[%c0_2, %c0_3] : memref<1x128xf32, #tpu.memory_space<vmem>>, vector<1x128xf32>
    tpu.vector_store %arg3[%c0_2, %c0_3], %6 {strides = array<i32>} : memref<1x128xf32, #tpu.memory_space<vmem>>, vector<1x128xf32>,
    return
  }
  func.func @transform_0(%arg0: i32, %arg1: memref<2xf32, #tpu.memory_space<smem>>) -> (i32, i32) {
    %c0_i32 = arith.constant 0 : i32
    %c0_i32_0 = arith.constant 0 : i32
    return %arg0, %c0_i32 : i32, i32
  }
  func.func @transform_1(%arg0: i32, %arg1: memref<2xf32, #tpu.memory_space<smem>>) -> (i32, i32) {
    %c0_i32 = arith.constant 0 : i32
    %c0_i32_0 = arith.constant 0 : i32
    return %arg0, %c0_i32 : i32, i32
  }
}

</mosaic_0001>

<bundles_post_ra>
// kernel: net_forward.1
= control target key start
LH: loop header
LB: loop body
LE: loop exit
PB: predicated region body
PF: predicated region fallthrough
CT: control target
= control target key end

     0   :  { %s68_s0 = inlined_call_operand.vmem [shape: f32[2], index: 0, kind: input, shape index: {}]   ;;  %s69_s1 = inlined_call_operand.vmem [shape: f32[1,128], index: 1, kind: input, shape index: {}]   ;;  %s70_s2 = inlined_call_operand.vmem [shape: f32[1,128], index: 2, kind: output, shape index: {}]  }
   0x1   :  { %s7_s11 = sshll.u32 %s68_s0, 4  ;;  %s8_s11 = int_to_ptr.vmem [resolvable:$true] %s7_s11 }
   0x2   :  { %s29_s12 = scalar_lea.vmem %s8_s11, 16  ;;  %p34_p1 = scmp.lt.s32.totalorder %s8_s11, %s8_s11 }
   0x3   :  { %p30_p0 = scmp.ne.s32.totalorder %s8_s11, %s29_s12  ;;  %p35_p2 = scmp.lt.s32.totalorder %s29_s12, %s29_s12 }
   0x5   :  { %p36_p3 = por %p35_p2, %p34_p1 }
   0x7   :  { %p37_p4 = pnand %p36_p3, %p30_p0 }
   0x9   :  { %40 = shalt.err (!%p37_p4)  }
   0xa   :  { %s43_s13 = smov [#allocation3]  }
   0xb   :  { %10 = dma.vmem_to_smem %s8_s11, 16, %s43_s13, [#allocation2] }
   0xc   :  { %41 = dma.done.wait [#allocation2], 16 }
   0xd   :  { %42 = vsyncadd [#allocation2], 4294967280 }
   0xe   :  { %12 = sfence }
   0xf   :  { %s15_s14 = sld [smem:[#allocation3]]  ;;  %s27_s15 = sld [smem:[#allocation3 + $0x1]]  ;;  %v17_v0 = vld [vmem:[%s69_s1] sm:$0x1] }
  0x15   :  { %v18_v1 = vstv %s15_s14  ;;  %v20_v2 = vstv %s27_s15 }
  0x16   :  { %v19_v3 = vmul.f32 %v18_v1, %v17_v0 }
  0x18   :  { %v21_v4 = vadd.f32 %v20_v2, %v19_v3 }
  0x1a   :  { %22 = vst [vmem:[%s70_s2] sm:$0x1] %v21_v4 }

</bundles_post_ra>
